<compile_context>
chip_gen: v6e
topology: v6e:2x2x1
jax: 0.10.0
libtpu: 0.0.40
codegen_flags: <defaults>
</compile_context>

<pallas_src>
import jax
import jax.numpy as jnp
from jax.experimental import pallas as pl
from jax.experimental.pallas import tpu as pltpu

_LANE = 128  # pad the hidden dim to a multiple of the 128-wide lane axis


def _round_up(x, m):
    return (x + m - 1) // m * m


def _qnet_kernel(x_ref, a_ref, w1x_ref, w1a_ref, b1_ref,
                 wf_ref, bf_ref, wout_ref, bout_ref, out_ref):
    # fc1 split over (x, a) — no concat — bf16 operands, f32 accumulation.
    xb = x_ref[...].astype(jnp.bfloat16)
    ab = a_ref[...].astype(jnp.bfloat16)
    h = jnp.dot(xb, w1x_ref[...], preferred_element_type=jnp.float32)
    h = h + jnp.dot(ab, w1a_ref[...], preferred_element_type=jnp.float32)
    h = jnp.maximum(h + b1_ref[...], 0.0)

    # Fused (attention-out-proj ∘ V-proj ∘ fc2) matmul + ReLU.
    # (Exact for seq_len == 1: softmax over a single key is 1; both attention
    #  projections and fc2 are linear with no nonlinearity in between, so the
    #  whole chain folds into one (H, H) matmul prepared offline.)
    h2 = jnp.dot(h.astype(jnp.bfloat16), wf_ref[...],
                 preferred_element_type=jnp.float32)
    h2 = jnp.maximum(h2 + bf_ref[...], 0.0)

    # fc_out (hidden -> 1) as a VPU multiply + lane reduction (no padded matmul).
    q = jnp.sum(h2 * wout_ref[...], axis=-1, keepdims=True) + bout_ref[...]
    out_ref[...] = q


def prepare_qnet_params(params, state_dim):
    """One-time prep: transpose to (in, out), fold attention+fc2, pad lanes, bf16 weights."""
    hidden = params["fc1_w"].shape[0]
    in_dim = params["fc1_w"].shape[1]
    action_dim = in_dim - state_dim
    hp = _round_up(hidden, _LANE)

    def pad(mat, rows, cols, dtype):
        mat = jnp.asarray(mat, jnp.float32)
        out = jnp.zeros((rows, cols), jnp.float32)
        out = out.at[:mat.shape[0], :mat.shape[1]].set(mat)
        return out.astype(dtype)

    # fc1, split into the x- and a- halves (done on the (in, out) transpose).
    w1 = params["fc1_w"].T.astype(jnp.float32)                # (in_dim, hidden)
    w1x = pad(w1[:state_dim], state_dim, hp, jnp.bfloat16)
    w1a = pad(w1[state_dim:], action_dim, hp, jnp.bfloat16)
    b1 = pad(params["fc1_b"].reshape(1, -1), 1, hp, jnp.float32)

    # Fold (V-projection -> out-projection -> fc2) into ONE (H, H) matmul.
    wv = params["in_proj_w"][2 * hidden:3 * hidden].astype(jnp.float32)  # (H, H)
    bv = params["in_proj_b"][2 * hidden:3 * hidden].astype(jnp.float32)  # (H,)
    wo = params["out_proj_w"].astype(jnp.float32)                        # (H, H)
    bo = params["out_proj_b"].astype(jnp.float32)                        # (H,)
    w2 = params["fc2_w"].T.astype(jnp.float32)                           # (H, H) in/out
    b2 = params["fc2_b"].astype(jnp.float32)                             # (H,)

    wattn = (wo @ wv).T                       # (H, H)  == wv.T @ wo.T
    battn = bv @ wo.T + bo                    # (H,)
    w_fused = wattn @ w2                      # (H, H)
    b_fused = battn @ w2 + b2                 # (H,)

    wf = pad(w_fused, hp, hp, jnp.bfloat16)
    bf = pad(b_fused.reshape(1, -1), 1, hp, jnp.float32)

    # fc_out row kept in f32 (VPU multiply + lane reduce, not an MXU matmul).
    wout = pad(params["fc_out_w"].reshape(1, -1), 1, hp, jnp.float32)    # (1, hp)
    bout = pad(params["fc_out_b"].reshape(1, 1), 1, 1, jnp.float32)      # (1, 1)

    return {"w1x": w1x, "w1a": w1a, "b1": b1,
            "wf": wf, "bf": bf, "wout": wout, "bout": bout}


def _choose_batch_tile(B, tile_b):
    """Batch tile: multiple of 8 (or full B); split >=2 steps for v7x's 2 TCs if possible."""
    tb = min(tile_b, B)
    if tb == B and B >= 16 and (B // 2) % 8 == 0:
        tb = B // 2                       # give both v7x TensorCores a grid step
    if tb != B and tb % 8 != 0:
        tb = max(8, (tb // 8) * 8)
    return tb


def qvalue_net_continuous(x, a, prep, tile_b=4096):
    """Forward pass.  x:(B, state_dim), a:(B, action_dim), prep from prepare_qnet_params.
    Returns (B, 1) float32."""
    B, state_dim = x.shape
    action_dim = a.shape[1]
    tb = _choose_batch_tile(B, tile_b)
    grid = (pl.cdiv(B, tb),)

    def act_spec(feat):
        return pl.BlockSpec((tb, feat), lambda i: (i, 0))

    def full_spec(arr):
        # Constant index_map -> the weight tile stays VMEM-resident across steps.
        return pl.BlockSpec(arr.shape, lambda i: (0, 0))

    weights = (prep["w1x"], prep["w1a"], prep["b1"],
               prep["wf"], prep["bf"], prep["wout"], prep["bout"])

    out = pl.pallas_call(
        _qnet_kernel,
        out_shape=jax.ShapeDtypeStruct((B, 1), jnp.float32),
        grid=grid,
        in_specs=[act_spec(state_dim), act_spec(action_dim)]
                 + [full_spec(w) for w in weights],
        out_specs=pl.BlockSpec((tb, 1), lambda i: (i, 0)),
        compiler_params=pltpu.CompilerParams(
            dimension_semantics=("parallel",),
            vmem_limit_bytes=32 * 1024 * 1024),
    )(x, a, *weights)

    return out


def init_params(key, state_dim, hidden_dim, action_dim):
    """Deterministic synthetic parameters matching the PyTorch module's shapes."""
    ks = jax.random.split(key, 10)

    def u(k, shape, fan_in):
        bound = 1.0 / jnp.sqrt(fan_in)
        return jax.random.uniform(k, shape, jnp.float32, -bound, bound)

    in_dim = state_dim + action_dim
    return {
        "fc1_w": u(ks[0], (hidden_dim, in_dim), in_dim),
        "fc1_b": u(ks[1], (hidden_dim,), in_dim),
        "in_proj_w": u(ks[2], (3 * hidden_dim, hidden_dim), hidden_dim),
        "in_proj_b": jnp.zeros((3 * hidden_dim,), jnp.float32),
        "out_proj_w": u(ks[3], (hidden_dim, hidden_dim), hidden_dim),
        "out_proj_b": jnp.zeros((hidden_dim,), jnp.float32),
        "fc2_w": u(ks[4], (hidden_dim, hidden_dim), hidden_dim),
        "fc2_b": u(ks[5], (hidden_dim,), hidden_dim),
        "fc_out_w": u(ks[6], (1, hidden_dim), hidden_dim),
        "fc_out_b": u(ks[7], (1,), hidden_dim),
    }


def _reference(x, a, params):
    """Pure-JAX f32 reference of the PyTorch forward (seq-len-1 attention => out_proj(V))."""
    hidden = params["fc1_w"].shape[0]
    cat = jnp.concatenate([x, a], axis=1)
    h = jax.nn.relu(cat @ params["fc1_w"].T + params["fc1_b"])
    v = h @ params["in_proj_w"][2 * hidden:].T + params["in_proj_b"][2 * hidden:]
    attn = v @ params["out_proj_w"].T + params["out_proj_b"]
    h2 = jax.nn.relu(attn @ params["fc2_w"].T + params["fc2_b"])
    return h2 @ params["fc_out_w"].T + params["fc_out_b"]


if __name__ == "__main__":
    state_dim, hidden_dim, action_dim = 16, 32, 4
    batch = 8

    key = jax.random.PRNGKey(0)
    k_x, k_a, k_p = jax.random.split(key, 3)
    x = jax.random.normal(k_x, (batch, state_dim), jnp.float32)
    a = jax.random.normal(k_a, (batch, action_dim), jnp.float32)
    params = init_params(k_p, state_dim, hidden_dim, action_dim)

    prep = prepare_qnet_params(params, state_dim)   # one-time fold / pad / transpose / bf16
    out = qvalue_net_continuous(x, a, prep)
    out = jax.block_until_ready(out)

    ref = _reference(x, a, params)
    assert out.shape == (batch, 1)
    # bf16 matmul operands + offline folding perturb f32 associativity; a SAC
    # critic comfortably tolerates this.
    err = float(jnp.max(jnp.abs(out - ref)))
    assert jnp.allclose(out, ref, atol=5e-2, rtol=5e-2), err
    print("KERNEL_OK")
</pallas_src>

<mosaic_0001>
module attributes {stable_mosaic.version = 11 : i64} {
  func.func @_qnet_kernel(%arg0: i32, %arg1: memref<8x16xf32, #tpu.memory_space<vmem>>, %arg2: memref<8x4xf32, #tpu.memory_space<vmem>>, %arg3: memref<16x128xbf16, #tpu.memory_space<vmem>>, %arg4: memref<4x128xbf16, #tpu.memory_space<vmem>>, %arg5: memref<1x128xf32, #tpu.memory_space<vmem>>, %arg6: memref<128x128xbf16, #tpu.memory_space<vmem>>, %arg7: memref<1x128xf32, #tpu.memory_space<vmem>>, %arg8: memref<1x128xf32, #tpu.memory_space<vmem>>, %arg9: memref<1x1xf32, #tpu.memory_space<vmem>>, %arg10: memref<8x1xf32, #tpu.memory_space<vmem>>) attributes {dimension_semantics = [#tpu.dimension_semantics<parallel>], iteration_bounds = array<i64: 1>, scalar_prefetch = 0 : i64, scratch_operands = 0 : i64, tpu.core_type = #tpu.core_type<tc>, window_params = [{transform_indices = @transform_0, window_bounds = array<i64: 8, 16>}, {transform_indices = @transform_1, window_bounds = array<i64: 8, 4>}, {pipeline_mode = #tpu.pipeline_mode<synchronous>, transform_indices = @transform_2, window_bounds = array<i64: 16, 128>}, {pipeline_mode = #tpu.pipeline_mode<synchronous>, transform_indices = @transform_3, window_bounds = array<i64: 4, 128>}, {pipeline_mode = #tpu.pipeline_mode<synchronous>, transform_indices = @transform_4, window_bounds = array<i64: 1, 128>}, {pipeline_mode = #tpu.pipeline_mode<synchronous>, transform_indices = @transform_5, window_bounds = array<i64: 128, 128>}, {pipeline_mode = #tpu.pipeline_mode<synchronous>, transform_indices = @transform_6, window_bounds = array<i64: 1, 128>}, {pipeline_mode = #tpu.pipeline_mode<synchronous>, transform_indices = @transform_7, window_bounds = array<i64: 1, 128>}, {pipeline_mode = #tpu.pipeline_mode<synchronous>, transform_indices = @transform_8, window_bounds = array<i64: 1, 1>}, {transform_indices = @transform_9, window_bounds = array<i64: 8, 1>}]} {
    %c0 = arith.constant 0 : index
    %c0_0 = arith.constant 0 : index
    %0 = vector.load %arg1[%c0, %c0_0] : memref<8x16xf32, #tpu.memory_space<vmem>>, vector<8x16xf32>
    %1 = arith.truncf %0 : vector<8x16xf32> to vector<8x16xbf16>
    %c0_1 = arith.constant 0 : index
    %c0_2 = arith.constant 0 : index
    %2 = vector.load %arg2[%c0_1, %c0_2] : memref<8x4xf32, #tpu.memory_space<vmem>>, vector<8x4xf32>
    %3 = arith.truncf %2 : vector<8x4xf32> to vector<8x4xbf16>
    %c0_3 = arith.constant 0 : index
    %c0_4 = arith.constant 0 : index
    %4 = vector.load %arg3[%c0_3, %c0_4] : memref<16x128xbf16, #tpu.memory_space<vmem>>, vector<16x128xbf16>
    %cst = arith.constant dense<0.000000e+00> : vector<8x128xf32>
    %5 = tpu.matmul %1, %4, %cst {dimension_numbers = #tpu.dot_dimension_numbers<[1], [0], [0], [1], [0, 0, 1, 1], [], []>} : vector<8x16xbf16>, vector<16x128xbf16>, vector<8x128xf32> -> vector<8x128xf32>
    %c0_5 = arith.constant 0 : index
    %c0_6 = arith.constant 0 : index
    %6 = vector.load %arg4[%c0_5, %c0_6] : memref<4x128xbf16, #tpu.memory_space<vmem>>, vector<4x128xbf16>
    %cst_7 = arith.constant dense<0.000000e+00> : vector<8x128xf32>
    %7 = tpu.matmul %3, %6, %cst_7 {dimension_numbers = #tpu.dot_dimension_numbers<[1], [0], [0], [1], [0, 0, 1, 1], [], []>} : vector<8x4xbf16>, vector<4x128xbf16>, vector<8x128xf32> -> vector<8x128xf32>
    %8 = arith.addf %5, %7 : vector<8x128xf32>
    %c0_8 = arith.constant 0 : index
    %c0_9 = arith.constant 0 : index
    %9 = vector.load %arg5[%c0_8, %c0_9] : memref<1x128xf32, #tpu.memory_space<vmem>>, vector<1x128xf32>
    %10 = vector.broadcast %9 : vector<1x128xf32> to vector<8x128xf32>
    %11 = arith.addf %8, %10 : vector<8x128xf32>
    %cst_10 = arith.constant 0.000000e+00 : f32
    %12 = vector.broadcast %cst_10 : f32 to vector<8x128xf32>
    %13 = arith.maximumf %11, %12 : vector<8x128xf32>
    %14 = arith.truncf %13 : vector<8x128xf32> to vector<8x128xbf16>
    %c0_11 = arith.constant 0 : index
    %c0_12 = arith.constant 0 : index
    %15 = vector.load %arg6[%c0_11, %c0_12] : memref<128x128xbf16, #tpu.memory_space<vmem>>, vector<128x128xbf16>
    %cst_13 = arith.constant dense<0.000000e+00> : vector<8x128xf32>
    %16 = tpu.matmul %14, %15, %cst_13 {dimension_numbers = #tpu.dot_dimension_numbers<[1], [0], [0], [1], [0, 0, 1, 1], [], []>} : vector<8x128xbf16>, vector<128x128xbf16>, vector<8x128xf32> -> vector<8x128xf32>
    %c0_14 = arith.constant 0 : index
    %c0_15 = arith.constant 0 : index
    %17 = vector.load %arg7[%c0_14, %c0_15] : memref<1x128xf32, #tpu.memory_space<vmem>>, vector<1x128xf32>
    %18 = vector.broadcast %17 : vector<1x128xf32> to vector<8x128xf32>
    %19 = arith.addf %16, %18 : vector<8x128xf32>
    %cst_16 = arith.constant 0.000000e+00 : f32
    %20 = vector.broadcast %cst_16 : f32 to vector<8x128xf32>
    %21 = arith.maximumf %19, %20 : vector<8x128xf32>
    %c0_17 = arith.constant 0 : index
    %c0_18 = arith.constant 0 : index
    %22 = vector.load %arg8[%c0_17, %c0_18] : memref<1x128xf32, #tpu.memory_space<vmem>>, vector<1x128xf32>
    %23 = vector.broadcast %22 : vector<1x128xf32> to vector<8x128xf32>
    %24 = arith.mulf %21, %23 : vector<8x128xf32>
    %cst_19 = arith.constant dense<0.000000e+00> : vector<8xf32>
    %25 = vector.multi_reduction <add>, %24, %cst_19 [1] : vector<8x128xf32> to vector<8xf32>
    %26 = vector.shape_cast %25 : vector<8xf32> to vector<8x1xf32>
    %c0_20 = arith.constant 0 : index
    %c0_21 = arith.constant 0 : index
    %27 = vector.load %arg9[%c0_20, %c0_21] : memref<1x1xf32, #tpu.memory_space<vmem>>, vector<1x1xf32>
    %28 = vector.broadcast %27 : vector<1x1xf32> to vector<8x1xf32>
    %29 = arith.addf %26, %28 : vector<8x1xf32>
    %c0_22 = arith.constant 0 : index
    %c0_23 = arith.constant 0 : index
    %30 = vector.load %arg10[%c0_22, %c0_23] : memref<8x1xf32, #tpu.memory_space<vmem>>, vector<8x1xf32>
    tpu.vector_store %arg10[%c0_22, %c0_23], %29 {strides = array<i32>} : memref<8x1xf32, #tpu.memory_space<vmem>>, vector<8x1xf32>,
    return
  }
  func.func @transform_0(%arg0: i32) -> (i32, i32) {
    %c0_i32 = arith.constant 0 : i32
    %c0_i32_0 = arith.constant 0 : i32
    return %arg0, %c0_i32 : i32, i32
  }
  func.func @transform_1(%arg0: i32) -> (i32, i32) {
    %c0_i32 = arith.constant 0 : i32
    %c0_i32_0 = arith.constant 0 : i32
    return %arg0, %c0_i32 : i32, i32
  }
  func.func @transform_2(%arg0: i32) -> (i32, i32) {
    %c0_i32 = arith.constant 0 : i32
    %c0_i32_0 = arith.constant 0 : i32
    %c0_i32_1 = arith.constant 0 : i32
    return %c0_i32, %c0_i32_0 : i32, i32
  }
  func.func @transform_3(%arg0: i32) -> (i32, i32) {
    %c0_i32 = arith.constant 0 : i32
    %c0_i32_0 = arith.constant 0 : i32
    %c0_i32_1 = arith.constant 0 : i32
    return %c0_i32, %c0_i32_0 : i32, i32
  }
  func.func @transform_4(%arg0: i32) -> (i32, i32) {
    %c0_i32 = arith.constant 0 : i32
    %c0_i32_0 = arith.constant 0 : i32
    %c0_i32_1 = arith.constant 0 : i32
    return %c0_i32, %c0_i32_0 : i32, i32
  }
  func.func @transform_5(%arg0: i32) -> (i32, i32) {
    %c0_i32 = arith.constant 0 : i32
    %c0_i32_0 = arith.constant 0 : i32
    %c0_i32_1 = arith.constant 0 : i32
    return %c0_i32, %c0_i32_0 : i32, i32
  }
  func.func @transform_6(%arg0: i32) -> (i32, i32) {
    %c0_i32 = arith.constant 0 : i32
    %c0_i32_0 = arith.constant 0 : i32
    %c0_i32_1 = arith.constant 0 : i32
    return %c0_i32, %c0_i32_0 : i32, i32
  }
  func.func @transform_7(%arg0: i32) -> (i32, i32) {
    %c0_i32 = arith.constant 0 : i32
    %c0_i32_0 = arith.constant 0 : i32
    %c0_i32_1 = arith.constant 0 : i32
    return %c0_i32, %c0_i32_0 : i32, i32
  }
  func.func @transform_8(%arg0: i32) -> (i32, i32) {
    %c0_i32 = arith.constant 0 : i32
    %c0_i32_0 = arith.constant 0 : i32
    %c0_i32_1 = arith.constant 0 : i32
    return %c0_i32, %c0_i32_0 : i32, i32
  }
  func.func @transform_9(%arg0: i32) -> (i32, i32) {
    %c0_i32 = arith.constant 0 : i32
    %c0_i32_0 = arith.constant 0 : i32
    return %arg0, %c0_i32 : i32, i32
  }
}

</mosaic_0001>

<bundles_post_ra>
// kernel: tpu_custom_call.1
= control target key start
LH: loop header
LB: loop body
LE: loop exit
PB: predicated region body
PF: predicated region fallthrough
CT: control target
= control target key end

     0   :  { %s485_s0 = inlined_call_operand.vmem [shape: f32[8,16], index: 0, kind: input, shape index: {}]   ;;  %s486_s1 = inlined_call_operand.vmem [shape: f32[8,4], index: 1, kind: input, shape index: {}]   ;;  %s487_s2 = inlined_call_operand.vmem [shape: bf16[16,128], index: 2, kind: input, shape index: {}]   ;;  %s488_s3 = inlined_call_operand.vmem [shape: bf16[4,128], index: 3, kind: input, shape index: {}]   ;;  %s489_s4 = inlined_call_operand.vmem [shape: f32[1,128], index: 4, kind: input, shape index: {}]   ;;  %s490_s5 = inlined_call_operand.hbm [shape: bf16[128,128], index: 5, kind: input, shape index: {}]   ;;  %s491_s6 = inlined_call_operand.vmem [shape: f32[1,128], index: 6, kind: input, shape index: {}]   ;;  %s492_s7 = inlined_call_operand.vmem [shape: f32[1,128], index: 7, kind: input, shape index: {}]   ;;  %s493_s8 = inlined_call_operand.<no memory space> [shape: f32[1,1], index: 8, kind: input, shape index: {}]   ;;  %s494_s9 = inlined_call_operand.vmem [shape: f32[8,1], index: 9, kind: output, shape index: {}]  }
   0x1   :  { %v14_v0 = vstv %s493_s8 }
   0x2   :  { %15 = vst [vmem:[#allocation2] sm:$0x1] %v14_v0 }
   0x3   :  { %16 = vsyncpa [#allocation4], 0  ;;  %s397_s11 = smov [#allocation3]  }
   0x4   :  { %s32_s12 = sshll.u32 %s397_s11, 4  ;;  %s33_s12 = int_to_ptr.vmem [resolvable:$true] %s32_s12 }
   0x5   :  { %s383_s13 = scalar_lea.vmem %s33_s12, 1024  ;;  %p388_p1 = scmp.lt.s32.totalorder %s33_s12, %s33_s12 }
   0x6   :  { %p384_p0 = scmp.ne.s32.totalorder %s33_s12, %s383_s13  ;;  %p389_p2 = scmp.lt.s32.totalorder %s383_s13, %s383_s13 }
   0x8   :  { %p390_p3 = por %p389_p2, %p388_p1 }
   0xa   :  { %p391_p4 = pnand %p390_p3, %p384_p0 }
   0xc   :  { %394 = shalt.err (!%p391_p4)
}
   0xd   :  { %s398_s14 = smov 64   ;;  %s399_s15 = smov 4  }
   0xe   :  { %38 = dma.hbm_to_vmem [thread:$0]  %s490_s5, 1024, %s33_s12, [#allocation4], %s398_s14, %s398_s14, %s399_s15  }
   0xf   :  { %395 = dma.done.wait [#allocation4], 1024  }
  0x10   :  { %396 = vsyncadd [#allocation4], 4294966272  ;;  %v400_v1 = vmov 0.0   ;;  %vm401_vm0 = vmmov 0   ;;  %vm60_vm1 = vcmask 1041408   ;;  %v51_v3 = vld [vmem:[%s486_s1] sm:$0xff] }
  0x11   :  { %329 = vmatprep.subr.bf16.mxu1 %v400_v1  ;;  %331 = vmatprep.mubr.msk.bf16.mxu1 %vm401_vm0, %v400_v1  ;;  %v55_v2 = vld [vmem:[%s488_s3] sm:$0x3]  ;;  %v52_v5 = vpack.c.bf16 %v51_v3, %v51_v3  ;;  %vm56_vm2 = vcmask 31744   ;;  %v368_v8 = vld [vmem:[#allocation3 + $0x30] sm:$0xff]   ;;  %v369_v10 = vld [vmem:[#allocation3 + $0x28] sm:$0xff]   ;;  %vm110_vm3 = vcmask 130048  }
  0x12   :  { %341 = vmatprep.subr.bf16.mxu0 %v400_v1  ;;  %357 = vmatprep.mubr.msk.bf16.mxu0 %vm401_vm0, %v400_v1  ;;  %v62_v4 = vsel %vm60_vm1, %v55_v2, 0  ;;  %v366_v6 = vld [vmem:[%s487_s2] sm:$0xff]   ;;  %v372_v14 = vld [vmem:[#allocation3 + $0x10] sm:$0xff]   ;;  %v373_v15 = vld [vmem:[#allocation3 + $0x8] sm:$0xff]   ;;  %vm294_vm4 = vcmask 7168  }
  0x13   :  { %330 = vmatpush3.bf16.msra.mxu1 %v62_v4  ;;  %v367_v7 = vld [vmem:[#allocation3 + $0x38] sm:$0xff]   ;;  %v370_v12 = vld [vmem:[#allocation3 + $0x20] sm:$0xff]  }
  0x14   :  { %335 = vmatprep.subr.bf16.mxu1 %v400_v1  ;;  %342 = vmatpush3.bf16.msra.mxu0 %v367_v7  ;;  %v49_v9 = vld [vmem:[%s485_s0] sm:$0xff] }
  0x15   :  { %343 = vmatprep.subr.bf16.mxu0 %v400_v1  ;;  %v50_v11 = vpack.c.bf16 %v49_v9, %v49_v9  ;;  %v371_v13 = vld [vmem:[#allocation3 + $0x18] sm:$0xff]   ;;  %v374_v16 = vld [vmem:[#allocation3] sm:$0xff]  }
  0x16   :  { %332 = vmatmul.mubr.msk.bf16.vlgmr.msra.gmra.mxu1 %vm56_vm2, %v52_v5  ;;  %v304_v22 = vld [vmem:[%s489_s4] ss:$0 sm:$0xff] }
  0x17   :  { %336 = vmatpush3.bf16.msra.mxu1 %v366_v6  ;;  %337 = vmatprep.mubr.msk.bf16.mxu1 %vm401_vm0, %v400_v1  ;;  %v305_v30 = vld [vmem:[%s491_s6] ss:$0 sm:$0xff] }
  0x18   :  { %344 = vmatpush3.bf16.msra.mxu0 %v368_v8  ;;  %v314_v34 = vld [vmem:[%s492_s7] ss:$0 sm:$0xff] }
  0x19   :  { %345 = vmatprep.subr.bf16.mxu0 %v400_v1  ;;  %v315_v39 = vld [vmem:[#allocation2] ss:$0 sm:$0xff] }
  0x1c   :  { %346 = vmatpush3.bf16.msra.mxu0 %v369_v10 }
  0x1d   :  { %347 = vmatprep.subr.bf16.mxu0 %v400_v1 }
  0x1e   :  { %338 = vmatmul.mubr.msk.bf16.vlgmr.msra.gmra.mxu1 %vm110_vm3, %v50_v11 }
  0x20   :  { %348 = vmatpush3.bf16.msra.mxu0 %v370_v12 }
  0x21   :  { %349 = vmatprep.subr.bf16.mxu0 %v400_v1 }
  0x24   :  { %350 = vmatpush3.bf16.msra.mxu0 %v371_v13 }
  0x25   :  { %351 = vmatprep.subr.bf16.mxu0 %v400_v1 }
  0x28   :  { %352 = vmatpush3.bf16.msra.mxu0 %v372_v14 }
  0x29   :  { %353 = vmatprep.subr.bf16.mxu0 %v400_v1 }
  0x2c   :  { %354 = vmatpush3.bf16.msra.mxu0 %v373_v15 }
  0x2d   :  { %355 = vmatprep.subr.bf16.mxu0 %v400_v1 }
  0x30   :  { %356 = vmatpush3.bf16.msra.mxu0 %v374_v16 }
  0xd6   :  { %v98_v17 = vpop.f32.mrf.mxu1 }
  0xd8   :  { %v333_v18 = vpop.f32.mrf.mxu1 }
  0xda   :  { %v101_v19 = vpop.f32.mrf.mxu1 }
  0xdc   :  { %v334_v20 = vpop.f32.mrf.mxu1 }
  0xde   :  { %v148_v21 = vpop.f32.mrf.mxu1 }
  0xdf   :  { %v149_v23 = vadd.f32 %v148_v21, %v98_v17 }
  0xe0   :  { %v339_v24 = vpop.f32.mrf.mxu1 }
  0xe1   :  { %v161_v25 = vadd.f32 %v304_v22, %v149_v23 }
  0xe2   :  { %v151_v26 = vpop.f32.mrf.mxu1 }
  0xe3   :  { %v162_v27 = vmax.f32 %v161_v25, 0.0 }
  0xe4   :  { %v340_v28 = vpop.f32.mrf.mxu1 }
  0xe5   :  { %v163_v29 = vpack.c.bf16 %v162_v27, %v162_v27 }
  0xe7   :  { %358 = vmatmul.mubr.bf16.vlgmr.msra.gmra.mxu0 %v163_v29 }
 0x1a7   :  { %v269_v31 = vpop.f32.mrf.mxu0 }
 0x1a8   :  { %v270_v32 = vadd.f32 %v305_v30, %v269_v31 }
 0x1a9   :  { %v359_v33 = vpop.f32.mrf.mxu0 }
 0x1aa   :  { %v275_v35 = vmax.f32 %v270_v32, 0.0 }
 0x1ab   :  { %v272_v36 = vpop.f32.mrf.mxu0 }
 0x1ac   :  { %v283_v37 = vmul.f32 %v314_v34, %v275_v35 }
 0x1ad   :  { %v360_v38 = vpop.f32.mrf.mxu0 }
 0x1ae   :  { %284 = vadd.xlane.f32.xlu0 %v283_v37 }
 0x237   :  { %v285_v40 = vpop.xlane.xlu0 %284 }
 0x238   :  { %v293_v41 = vadd.f32 %v315_v39, %v285_v40 }
 0x23a   :  { %295 = vst.msk [vmem:[%s494_s9] sm:$0xff] %vm294_vm4, %v293_v41 }
 0x23b   :  { %300 = vsyncpa [#allocation4], 1 }

</bundles_post_ra>
